<compile_context>
chip_gen: v6e
topology: v6e:2x2x1
jax: 0.10.0
libtpu: 0.0.40
codegen_flags: <defaults>
</compile_context>

<pallas_src>
import functools

import jax
import jax.numpy as jnp
from jax.experimental import pallas as pl
from jax.experimental.pallas import tpu as pltpu


def _vmem_budget_bytes():
    """~96 MiB scoped on 128-MiB-VMEM parts (v5e/v6e), ~44 MiB on 64-MiB parts
    (v7x); leaves headroom for Mosaic internal scratch."""
    cap = 128 * 1024 * 1024
    try:
        info = pltpu.get_tpu_info()
        cap = int(getattr(info, "vmem_capacity_bytes", cap))
    except Exception:
        pass
    return (96 if cap >= 128 * 1024 * 1024 else 44) * 1024 * 1024


_VMEM_LIMIT = _vmem_budget_bytes()
_BIG_VMEM = _VMEM_LIMIT > 64 * 1024 * 1024


def _pick_tile(dim, target, align):
    """Largest tile <= target that evenly divides dim and is a multiple of
    `align`; falls back to the full dim (always a legal block size)."""
    if dim <= target:
        return dim
    t = (target // align) * align
    while t >= align:
        if dim % t == 0:
            return t
        t -= align
    return dim


# -----------------------------------------------------------------------------
# (1) Prefix mapper MLP: Linear -> Tanh -> Linear.
#     Second matmul tiled over output columns; hidden activation computed once
#     (grid step 0) into a VMEM scratch and reused for every column tile.
# -----------------------------------------------------------------------------

def _mapper_kernel(x_ref, w1_ref, b1_ref, w2_ref, b2_ref, o_ref, h_sc):
    @pl.when(pl.program_id(0) == 0)
    def _():
        h = jnp.dot(x_ref[...].astype(jnp.bfloat16), w1_ref[...],
                    preferred_element_type=jnp.float32) + b1_ref[...]
        h_sc[...] = jnp.tanh(h)

    y = jnp.dot(h_sc[...].astype(jnp.bfloat16), w2_ref[...],
                preferred_element_type=jnp.float32) + b2_ref[...]
    o_ref[...] = y.astype(o_ref.dtype)


def prefix_mapper(clip_prefix, params):
    B, Pd = clip_prefix.shape
    mid = params["map_w1"].shape[1]
    out = params["map_w2"].shape[1]
    tn = _pick_tile(out, 4096 if _BIG_VMEM else 2048, 128)
    return pl.pallas_call(
        _mapper_kernel,
        out_shape=jax.ShapeDtypeStruct((B, out), jnp.float32),
        grid=(out // tn,),
        in_specs=[
            pl.BlockSpec((B, Pd), lambda j: (0, 0)),      # x resident
            pl.BlockSpec((Pd, mid), lambda j: (0, 0)),    # w1 resident
            pl.BlockSpec((1, mid), lambda j: (0, 0)),     # b1 resident
            pl.BlockSpec((mid, tn), lambda j: (0, j)),    # w2 column tile
            pl.BlockSpec((1, tn), lambda j: (0, j)),      # b2 column tile
        ],
        out_specs=pl.BlockSpec((B, tn), lambda j: (0, j)),
        scratch_shapes=[pltpu.VMEM((B, mid), jnp.float32)],
        compiler_params=pltpu.CompilerParams(
            dimension_semantics=("arbitrary",),   # h_sc carried across tiles
            vmem_limit_bytes=_VMEM_LIMIT),
    )(clip_prefix,
      params["map_w1"], params["map_b1"].reshape(1, -1),
      params["map_w2"], params["map_b2"].reshape(1, -1))


# -----------------------------------------------------------------------------
# (3) Whole GPT-2 transformer stack in a single pallas_call.
#     grid = (batch [parallel], layer [arbitrary]).
#     Residual stream kept in a f32 VMEM scratch; embeddings assembled at
#     layer 0; final LayerNorm fused into the last layer; output is bf16.
# -----------------------------------------------------------------------------

def _gpt2_stack_kernel(pref_ref, tok_ref, wpe_ref,
                       ln1_g_ref, ln1_b_ref, wqkv_ref, bqkv_ref,
                       wo_ref, bo_ref, ln2_g_ref, ln2_b_ref,
                       wfc_ref, bfc_ref, wmlp_ref, bmlp_ref,
                       lnf_g_ref, lnf_b_ref,
                       o_ref,
                       x_sc, attn_sc,
                       *, n_head, scale, prefix_len):
    l = pl.program_id(1)
    T, H = x_sc.shape
    Dh = H // n_head
    L = prefix_len

    # ---- layer 0: assemble embeddings = concat(prefix, tokens) + wpe ----
    @pl.when(l == 0)
    def _():
        x_sc[:L, :] = pref_ref[...] + wpe_ref[:L, :]
        x_sc[L:, :] = tok_ref[...] + wpe_ref[L:, :]

    def ln(v, g_ref, b_ref):
        mu = jnp.mean(v, axis=-1, keepdims=True)
        var = jnp.mean((v - mu) * (v - mu), axis=-1, keepdims=True)
        return (v - mu) * jax.lax.rsqrt(var + 1e-5) * g_ref[...] + b_ref[...]

    def mm(a, w_ref):  # bf16 MXU matmul, f32 accumulation
        return jnp.dot(a.astype(jnp.bfloat16), w_ref[...],
                       preferred_element_type=jnp.float32)

    x = x_sc[...]                                           # [T, H] f32

    # ---- attention sublayer ----
    h = ln(x, ln1_g_ref, ln1_b_ref)
    qkv = mm(h, wqkv_ref) + bqkv_ref[...]                   # [T, 3H] f32
    q_all = qkv[:, 0:H].astype(jnp.bfloat16)
    k_all = qkv[:, H:2 * H].astype(jnp.bfloat16)
    v_all = qkv[:, 2 * H:3 * H].astype(jnp.bfloat16)

    qi = jax.lax.broadcasted_iota(jnp.int32, (T, T), 0)
    ki = jax.lax.broadcasted_iota(jnp.int32, (T, T), 1)
    causal = ki <= qi
    neg = jnp.float32(-1e30)

    # TODO(synk): for large T, switch to flash-style query-row tiling with
    # online softmax to bound the [T, T] / [T, 4H] intermediates.
    for hh in range(n_head):
        sl = slice(hh * Dh, (hh + 1) * Dh)
        s = jax.lax.dot_general(q_all[:, sl], k_all[:, sl],
                                (((1,), (1,)), ((), ())),
                                preferred_element_type=jnp.float32) * scale
        s = jnp.where(causal, s, neg)
        m = jnp.max(s, axis=-1, keepdims=True)
        p = jnp.exp(s - m)
        p = p * pl.reciprocal(jnp.sum(p, axis=-1, keepdims=True))   # exact
        # store this head's output into the VMEM scratch -> retires the
        # per-head [T,T] intermediates, no concatenate relayout.
        attn_sc[:, sl] = jnp.dot(p.astype(jnp.bfloat16), v_all[:, sl],
                                 preferred_element_type=jnp.float32)

    x = x + mm(attn_sc[...], wo_ref) + bo_ref[...]          # residual

    # ---- MLP sublayer ----
    h2 = ln(x, ln2_g_ref, ln2_b_ref)
    u = mm(h2, wfc_ref) + bfc_ref[...]                      # [T, 4H]
    u = 0.5 * u * (1.0 + jnp.tanh(0.7978845608028654
                                  * (u + 0.044715 * u * u * u)))   # gelu_new
    x = x + mm(u, wmlp_ref) + bmlp_ref[...]                 # residual

    x_sc[...] = x                                           # carry to next layer

    # ---- last layer: fused final LayerNorm epilogue (hoisted out of lm_head)
    @pl.when(l == pl.num_programs(1) - 1)
    def _():
        o_ref[...] = ln(x, lnf_g_ref, lnf_b_ref).astype(o_ref.dtype)


def gpt2_stack(prefix_embeds, token_embeds, wpe_slice, p, n_head):
    B, Lp, H = prefix_embeds.shape
    S = token_embeds.shape[1]
    T = Lp + S
    n_layer = p["ln1_g"].shape[0]
    scale = 1.0 / ((H // n_head) ** 0.5)

    def per_layer(arr):   # stacked [n_layer, d1, d2] -> layer slice per grid l
        d1, d2 = arr.shape[1], arr.shape[2]
        return pl.BlockSpec((None, d1, d2), lambda b, l: (l, 0, 0))

    def resident2(arr):   # small constant 2-D block, stays in VMEM
        return pl.BlockSpec(arr.shape, lambda b, l: (0, 0))

    layer_weights = (
        p["ln1_g"], p["ln1_b"], p["attn_w"], p["attn_b"],
        p["attn_proj_w"], p["attn_proj_b"], p["ln2_g"], p["ln2_b"],
        p["fc_w"], p["fc_b"], p["mlp_proj_w"], p["mlp_proj_b"],
    )

    return pl.pallas_call(
        functools.partial(_gpt2_stack_kernel, n_head=n_head, scale=scale,
                          prefix_len=Lp),
        out_shape=jax.ShapeDtypeStruct((B, T, H), jnp.bfloat16),
        grid=(B, n_layer),
        in_specs=([
            pl.BlockSpec((None, Lp, H), lambda b, l: (b, 0, 0)),
            pl.BlockSpec((None, S, H), lambda b, l: (b, 0, 0)),
            resident2(wpe_slice),
        ] + [per_layer(w) for w in layer_weights]
          + [resident2(p["lnf_g"]), resident2(p["lnf_b"])]),
        out_specs=pl.BlockSpec((None, T, H), lambda b, l: (b, 0, 0)),
        scratch_shapes=[pltpu.VMEM((T, H), jnp.float32),   # residual carry
                        pltpu.VMEM((T, H), jnp.float32)],  # merged-head attn
        compiler_params=pltpu.CompilerParams(
            dimension_semantics=("parallel", "arbitrary"),
            vmem_limit_bytes=_VMEM_LIMIT),
    )(prefix_embeds, token_embeds, wpe_slice, *layer_weights,
      p["lnf_g"], p["lnf_b"])


# -----------------------------------------------------------------------------
# (4) Tied lm_head: tiled matmul (input already final-LayerNorm'd, bf16).
#     Grid = (vocab OUTER, rows INNER) so each wte tile is DMA'd exactly once
#     and only the small activation tile is re-streamed; wte stays [V, H]
#     (contraction over H, never transposed in HBM).
# -----------------------------------------------------------------------------

def _lm_head_kernel(x_ref, w_ref, o_ref):
    o_ref[...] = jax.lax.dot_general(
        x_ref[...], w_ref[...],
        dimension_numbers=(((1,), (1,)), ((), ())),
        preferred_element_type=jnp.float32).astype(o_ref.dtype)


def lm_head(y, wte):
    M, H = y.shape
    V = wte.shape[0]
    tm = _pick_tile(M, 512 if _BIG_VMEM else 256, 8)
    tn = _pick_tile(V, 4096 if _BIG_VMEM else 2048, 128)
    grid = (V // tn, M // tm)          # vocab outer, rows inner
    return pl.pallas_call(
        _lm_head_kernel,
        out_shape=jax.ShapeDtypeStruct((M, V), jnp.float32),
        grid=grid,
        in_specs=[
            pl.BlockSpec((tm, H), lambda j, i: (i, 0)),   # small, streamed
            pl.BlockSpec((tn, H), lambda j, i: (j, 0)),   # resident per j
        ],
        out_specs=pl.BlockSpec((tm, tn), lambda j, i: (i, j)),
        compiler_params=pltpu.CompilerParams(
            dimension_semantics=("parallel", "arbitrary"),
            vmem_limit_bytes=_VMEM_LIMIT),
    )(y, wte)


# -----------------------------------------------------------------------------
# Model glue (plain JAX: embedding gather, reshapes between kernels).
# -----------------------------------------------------------------------------

def clip_caption_forward(params, token_sequence, clip_prefix, cfg):
    """Returns GPT-2 LM logits over [prefix ++ tokens]."""
    B = token_sequence.shape[0]
    H = cfg["hidden"]
    L = cfg["prefix_length"]
    S = token_sequence.shape[1]
    T = L + S
    assert T <= cfg["n_ctx"], (T, cfg["n_ctx"])

    # prefix_mapper = MLP(prefix_dim -> L*H//2 -> L*H), Tanh in between
    prefix_embeds = prefix_mapper(clip_prefix, params).reshape(B, L, H)

    # gpt2.transformer.wte lookup (gather kept in plain-JAX glue)
    token_embeds = jnp.take(params["wte"], token_sequence,
                            axis=0).astype(jnp.float32)

    # full transformer stack (embedding assembly + blocks + final LN), one call
    y = gpt2_stack(prefix_embeds, token_embeds, params["wpe"][:T],
                   params, cfg["n_head"])

    # tied lm_head over the already-normalized bf16 stream
    logits = lm_head(y.reshape(B * T, H), params["wte"])
    return logits.reshape(B, T, cfg["vocab"])
    # TODO(synk): optional cross-entropy loss (labels=...) and attention_mask
    # paths of the PyTorch module are not implemented (defaults are None).


# -----------------------------------------------------------------------------
# Deterministic parameter init (synthetic small GPT-2). Matmul weights bf16,
# LN params / biases / wpe f32. Per-layer weights stacked on a leading
# [n_layer] axis so a single kernel can index them by the layer grid axis.
# -----------------------------------------------------------------------------

def init_params(key, cfg):
    H = cfg["hidden"]
    V = cfg["vocab"]
    L = cfg["prefix_length"]
    Pd = cfg["prefix_dim"]
    NL = cfg["n_layer"]
    mid = L * H // 2
    out = L * H

    def nrm(k, shape, dtype=jnp.bfloat16):
        return (0.02 * jax.random.normal(k, shape)).astype(dtype)

    keys = iter(jax.random.split(key, 16))
    return {
        "wte": nrm(next(keys), (V, H)),                        # tied lm_head
        "wpe": nrm(next(keys), (cfg["n_ctx"], H), jnp.float32),
        "lnf_g": jnp.ones((1, H), jnp.float32),
        "lnf_b": jnp.zeros((1, H), jnp.float32),
        "map_w1": nrm(next(keys), (Pd, mid)),
        "map_b1": jnp.zeros((mid,), jnp.float32),
        "map_w2": nrm(next(keys), (mid, out)),
        "map_b2": jnp.zeros((out,), jnp.float32),
        # stacked per-layer block weights
        "ln1_g": jnp.ones((NL, 1, H), jnp.float32),
        "ln1_b": jnp.zeros((NL, 1, H), jnp.float32),
        "attn_w": nrm(next(keys), (NL, H, 3 * H)),
        "attn_b": jnp.zeros((NL, 1, 3 * H), jnp.float32),
        "attn_proj_w": nrm(next(keys), (NL, H, H)),
        "attn_proj_b": jnp.zeros((NL, 1, H), jnp.float32),
        "ln2_g": jnp.ones((NL, 1, H), jnp.float32),
        "ln2_b": jnp.zeros((NL, 1, H), jnp.float32),
        "fc_w": nrm(next(keys), (NL, H, 4 * H)),
        "fc_b": jnp.zeros((NL, 1, 4 * H), jnp.float32),
        "mlp_proj_w": nrm(next(keys), (NL, 4 * H, H)),
        "mlp_proj_b": jnp.zeros((NL, 1, H), jnp.float32),
    }


if __name__ == "__main__":
    cfg = dict(
        prefix_length=4,   # ClipCap prefix length
        prefix_dim=16,     # CLIP feature dim (small synthetic)
        hidden=32,         # GPT-2 hidden size (small synthetic)
        n_head=4,
        n_layer=2,
        vocab=128,
        n_ctx=16,
    )
    key = jax.random.PRNGKey(0)
    kp, kt, kc = jax.random.split(key, 3)

    params = init_params(kp, cfg)

    batch, seq = 2, 8
    token_sequence = jax.random.randint(kt, (batch, seq), 0, cfg["vocab"],
                                        dtype=jnp.int32)
    clip_prefix = jax.random.normal(kc, (batch, cfg["prefix_dim"]),
                                    dtype=jnp.float32)

    logits = clip_caption_forward(params, token_sequence, clip_prefix, cfg)
    logits = jax.block_until_ready(logits)

    expected = (batch, cfg["prefix_length"] + seq, cfg["vocab"])
    assert logits.shape == expected, (logits.shape, expected)
    assert jnp.all(jnp.isfinite(logits))
    print("KERNEL_OK")
</pallas_src>

<mosaic_0001>
module attributes {stable_mosaic.version = 11 : i64} {
  func.func @_mapper_kernel(%arg0: i32, %arg1: memref<2x16xf32, #tpu.memory_space<vmem>>, %arg2: memref<16x64xbf16, #tpu.memory_space<vmem>>, %arg3: memref<1x64xf32, #tpu.memory_space<vmem>>, %arg4: memref<64x128xbf16, #tpu.memory_space<vmem>>, %arg5: memref<1x128xf32, #tpu.memory_space<vmem>>, %arg6: memref<2x128xf32, #tpu.memory_space<vmem>>, %arg7: memref<2x64xf32, #tpu.memory_space<vmem>>) attributes {dimension_semantics = [#tpu.dimension_semantics<arbitrary>], iteration_bounds = array<i64: 1>, scalar_prefetch = 0 : i64, scratch_operands = 1 : i64, tpu.core_type = #tpu.core_type<tc>, window_params = [{pipeline_mode = #tpu.pipeline_mode<synchronous>, transform_indices = @transform_0, window_bounds = array<i64: 2, 16>}, {pipeline_mode = #tpu.pipeline_mode<synchronous>, transform_indices = @transform_1, window_bounds = array<i64: 16, 64>}, {pipeline_mode = #tpu.pipeline_mode<synchronous>, transform_indices = @transform_2, window_bounds = array<i64: 1, 64>}, {transform_indices = @transform_3, window_bounds = array<i64: 64, 128>}, {transform_indices = @transform_4, window_bounds = array<i64: 1, 128>}, {transform_indices = @transform_5, window_bounds = array<i64: 2, 128>}]} {
    %c0_i32 = arith.constant 0 : i32
    %0 = arith.cmpi eq, %arg0, %c0_i32 : i32
    %1 = arith.extui %0 : i1 to i32
    %c0_i32_0 = arith.constant 0 : i32
    %2 = arith.cmpi ne, %1, %c0_i32_0 : i32
    scf.if %2 {
      %c0_8 = arith.constant 0 : index
      %c0_9 = arith.constant 0 : index
      %11 = vector.load %arg1[%c0_8, %c0_9] : memref<2x16xf32, #tpu.memory_space<vmem>>, vector<2x16xf32>
      %12 = arith.truncf %11 : vector<2x16xf32> to vector<2x16xbf16>
      %c0_10 = arith.constant 0 : index
      %c0_11 = arith.constant 0 : index
      %13 = vector.load %arg2[%c0_10, %c0_11] : memref<16x64xbf16, #tpu.memory_space<vmem>>, vector<16x64xbf16>
      %cst_12 = arith.constant dense<0.000000e+00> : vector<2x64xf32>
      %14 = tpu.matmul %12, %13, %cst_12 {dimension_numbers = #tpu.dot_dimension_numbers<[1], [0], [0], [1], [0, 0, 1, 1], [], []>} : vector<2x16xbf16>, vector<16x64xbf16>, vector<2x64xf32> -> vector<2x64xf32>
      %c0_13 = arith.constant 0 : index
      %c0_14 = arith.constant 0 : index
      %15 = vector.load %arg3[%c0_13, %c0_14] : memref<1x64xf32, #tpu.memory_space<vmem>>, vector<1x64xf32>
      %16 = vector.broadcast %15 : vector<1x64xf32> to vector<2x64xf32>
      %17 = arith.addf %14, %16 : vector<2x64xf32>
      %18 = math.tanh %17 : vector<2x64xf32>
      %c0_15 = arith.constant 0 : index
      %c0_16 = arith.constant 0 : index
      %19 = vector.load %arg7[%c0_15, %c0_16] : memref<2x64xf32, #tpu.memory_space<vmem>>, vector<2x64xf32>
      tpu.vector_store %arg7[%c0_15, %c0_16], %18 {strides = array<i32>} : memref<2x64xf32, #tpu.memory_space<vmem>>, vector<2x64xf32>,
    } else {
    }
    %c0 = arith.constant 0 : index
    %c0_1 = arith.constant 0 : index
    %3 = vector.load %arg7[%c0, %c0_1] : memref<2x64xf32, #tpu.memory_space<vmem>>, vector<2x64xf32>
    %4 = arith.truncf %3 : vector<2x64xf32> to vector<2x64xbf16>
    %c0_2 = arith.constant 0 : index
    %c0_3 = arith.constant 0 : index
    %5 = vector.load %arg4[%c0_2, %c0_3] : memref<64x128xbf16, #tpu.memory_space<vmem>>, vector<64x128xbf16>
    %cst = arith.constant dense<0.000000e+00> : vector<2x128xf32>
    %6 = tpu.matmul %4, %5, %cst {dimension_numbers = #tpu.dot_dimension_numbers<[1], [0], [0], [1], [0, 0, 1, 1], [], []>} : vector<2x64xbf16>, vector<64x128xbf16>, vector<2x128xf32> -> vector<2x128xf32>
    %c0_4 = arith.constant 0 : index
    %c0_5 = arith.constant 0 : index
    %7 = vector.load %arg5[%c0_4, %c0_5] : memref<1x128xf32, #tpu.memory_space<vmem>>, vector<1x128xf32>
    %8 = vector.broadcast %7 : vector<1x128xf32> to vector<2x128xf32>
    %9 = arith.addf %6, %8 : vector<2x128xf32>
    %c0_6 = arith.constant 0 : index
    %c0_7 = arith.constant 0 : index
    %10 = vector.load %arg6[%c0_6, %c0_7] : memref<2x128xf32, #tpu.memory_space<vmem>>, vector<2x128xf32>
    tpu.vector_store %arg6[%c0_6, %c0_7], %9 {strides = array<i32>} : memref<2x128xf32, #tpu.memory_space<vmem>>, vector<2x128xf32>,
    return
  }
  func.func @transform_0(%arg0: i32) -> (i32, i32) {
    %c0_i32 = arith.constant 0 : i32
    %c0_i32_0 = arith.constant 0 : i32
    %c0_i32_1 = arith.constant 0 : i32
    return %c0_i32, %c0_i32_0 : i32, i32
  }
  func.func @transform_1(%arg0: i32) -> (i32, i32) {
    %c0_i32 = arith.constant 0 : i32
    %c0_i32_0 = arith.constant 0 : i32
    %c0_i32_1 = arith.constant 0 : i32
    return %c0_i32, %c0_i32_0 : i32, i32
  }
  func.func @transform_2(%arg0: i32) -> (i32, i32) {
    %c0_i32 = arith.constant 0 : i32
    %c0_i32_0 = arith.constant 0 : i32
    %c0_i32_1 = arith.constant 0 : i32
    return %c0_i32, %c0_i32_0 : i32, i32
  }
  func.func @transform_3(%arg0: i32) -> (i32, i32) {
    %c0_i32 = arith.constant 0 : i32
    %c0_i32_0 = arith.constant 0 : i32
    return %c0_i32, %arg0 : i32, i32
  }
  func.func @transform_4(%arg0: i32) -> (i32, i32) {
    %c0_i32 = arith.constant 0 : i32
    %c0_i32_0 = arith.constant 0 : i32
    return %c0_i32, %arg0 : i32, i32
  }
  func.func @transform_5(%arg0: i32) -> (i32, i32) {
    %c0_i32 = arith.constant 0 : i32
    %c0_i32_0 = arith.constant 0 : i32
    return %c0_i32, %arg0 : i32, i32
  }
}

</mosaic_0001>

<bundles_post_ra>
// kernel: tpu_custom_call.1
= control target key start
LH: loop header
LB: loop body
LE: loop exit
PB: predicated region body
PF: predicated region fallthrough
CT: control target
= control target key end

     0   :  { %10 = vsyncpa [#allocation4], 0  ;;  %s422_s0 = inlined_call_operand.hbm [shape: f32[2,16], index: 0, kind: input, shape index: {}]   ;;  %s423_s1 = inlined_call_operand.hbm [shape: bf16[16,64], index: 1, kind: input, shape index: {}]   ;;  %s424_s2 = inlined_call_operand.vmem [shape: f32[1,64], index: 2, kind: input, shape index: {}]   ;;  %s425_s3 = inlined_call_operand.hbm [shape: bf16[64,128], index: 3, kind: input, shape index: {}]   ;;  %s426_s4 = inlined_call_operand.vmem [shape: f32[1,128], index: 4, kind: input, shape index: {}]   ;;  %s427_s5 = inlined_call_operand.hbm [shape: f32[2,128], index: 5, kind: output, shape index: {}]  }
   0x1   :  { %11 = vsyncpa [#allocation7], 0 }
   0x2   :  { %12 = vsyncpa [#allocation5], 0  ;;  %s366_s18 = smov [#allocation6]  }
   0x3   :  { %s28_s19 = sshll.u32 %s366_s18, 4  ;;  %s29_s19 = int_to_ptr.vmem [resolvable:$true] %s28_s19 }
   0x4   :  { %s288_s20 = scalar_lea.vmem %s29_s19, 128  ;;  %p293_p1 = scmp.lt.s32.totalorder %s29_s19, %s29_s19 }
   0x5   :  { %p289_p0 = scmp.ne.s32.totalorder %s29_s19, %s288_s20  ;;  %p294_p2 = scmp.lt.s32.totalorder %s288_s20, %s288_s20 }
   0x7   :  { %p295_p3 = por %p294_p2, %p293_p1 }
   0x9   :  { %p296_p4 = pnand %p295_p3, %p289_p0 }
   0xb   :  { %299 = shalt.err (!%p296_p4)
}
   0xc   :  { %s367_s21 = smov 64   ;;  %s368_s22 = smov 4  }
   0xd   :  { %34 = dma.hbm_to_vmem [thread:$0]  %s423_s1, 128, %s29_s19, [#allocation7], %s367_s21, %s367_s21, %s368_s22  }
   0xe   :  { %s369_s25 = smov [#allocation3]   ;;  %s370_s27 = smov [#allocation8]  }
   0xf   :  { %s19_s26 = sshll.u32 %s369_s25, 4  ;;  %s42_s28 = sshll.u32 %s370_s27, 4  ;;  %s20_s26 = int_to_ptr.vmem [resolvable:$true] %s19_s26  ;;  %s43_s28 = int_to_ptr.vmem [resolvable:$true] %s42_s28 }
  0x10   :  { %s308_s29 = scalar_lea.vmem %s20_s26, 32  ;;  %p313_p6 = scmp.lt.s32.totalorder %s20_s26, %s20_s26 }
  0x11   :  { %p309_p5 = scmp.ne.s32.totalorder %s20_s26, %s308_s29  ;;  %p314_p7 = scmp.lt.s32.totalorder %s308_s29, %s308_s29 }
  0x13   :  { %p315_p8 = por %p314_p7, %p313_p6 }
  0x15   :  { %p316_p9 = pnand %p315_p8, %p309_p5 }
  0x17   :  { %319 = shalt.err (!%p316_p9)
}
  0x18   :  { %22 = dma.hbm_to_vmem [thread:$0]  %s422_s0, 32, %s20_s26, [#allocation4]  }
  0x19   :  { %s328_s7 = scalar_lea.vmem %s43_s28, 512  ;;  %p333_p11 = scmp.lt.s32.totalorder %s43_s28, %s43_s28 }
  0x1a   :  { %p329_p10 = scmp.ne.s32.totalorder %s43_s28, %s328_s7  ;;  %p334_p12 = scmp.lt.s32.totalorder %s328_s7, %s328_s7 }
  0x1c   :  { %p335_p13 = por %p334_p12, %p333_p11 }
  0x1e   :  { %p336_p0 = pnand %p335_p13, %p329_p10 }
  0x20   :  { %339 = shalt.err (!%p336_p0)
}
  0x21   :  { %48 = dma.hbm_to_vmem [thread:$0]  %s425_s3, 512, %s43_s28, [#allocation7], %s367_s21, %s367_s21, %s368_s22  }
  0x22   :  { %360 = dma.done.wait [#allocation4], 32  }
  0x23   :  { %361 = vsyncadd [#allocation4], 4294967264 }
  0x24   :  { %362 = dma.done.wait [#allocation7], 640  }
  0x25   :  { %363 = vsyncadd [#allocation7], 4294966656  ;;  %v371_v0 = vmov 0.0   ;;  %vm372_vm0 = vmmov 0   ;;  %v273_v1 = vld [vmem:[#allocation6] sm:$0xff]   ;;  %vm82_vm1 = vcmask 130048  }
  0x26   :  { %247 = vmatprep.subr.bf16.mxu0 %v371_v0  ;;  %249 = vmatprep.mubr.msk.bf16.mxu0 %vm372_vm0, %v371_v0  ;;  %v65_v2 = vld [vmem:[#allocation3] sm:$0x3]  ;;  %v274_v4 = vld [vmem:[#allocation8 + $0x18] sm:$0xff]   ;;  %v276_v6 = vld [vmem:[#allocation8 + $0x8] sm:$0xff]   ;;  %vm127_vm2 = vcmask 517120   ;;  %vm170_vm3 = vcmask 523264  }
  0x27   :  { %253 = vmatprep.subr.bf16.mxu1 %v371_v0  ;;  %261 = vmatprep.mubr.msk.bf16.mxu1 %vm372_vm0, %v371_v0  ;;  %v66_v3 = vpack.c.bf16 %v65_v2, %v65_v2  ;;  %v275_v5 = vld [vmem:[#allocation8 + $0x10] sm:$0xff]   ;;  %v277_v7 = vld [vmem:[#allocation8] sm:$0xff]   ;;  %s373_s11 = smov [#allocation9]  }
  0x28   :  { %248 = vmatpush3.bf16.msra.mxu0 %v273_v1  ;;  %254 = vmatpush3.bf16.msra.mxu1 %v274_v4  ;;  %v231_v8 = vld [vmem:[%s424_s2] ss:$0 sm:$0xff]  ;;  %s221_s12 = sshll.u32 %s373_s11, 4  ;;  %s222_s12 = int_to_ptr.vmem [resolvable:$true] %s221_s12 }
  0x29   :  { %255 = vmatprep.subr.bf16.mxu1 %v371_v0  ;;  %v234_v17 = vld [vmem:[%s426_s4] ss:$0 sm:$0xff]  ;;  %s340_s2 = scalar_lea.vmem %s222_s12, 32  ;;  %p345_p2 = scmp.lt.s32.totalorder %s222_s12, %s222_s12 }
  0x2a   :  { %p341_p1 = scmp.ne.s32.totalorder %s222_s12, %s340_s2  ;;  %p346_p3 = scmp.lt.s32.totalorder %s340_s2, %s340_s2 }
  0x2b   :  { %250 = vmatmul.mubr.msk.bf16.vlgmr.msra.gmra.mxu0 %vm82_vm1, %v66_v3 }
  0x2c   :  { %256 = vmatpush3.bf16.msra.mxu1 %v275_v5  ;;  %p347_p4 = por %p346_p3, %p345_p2 }
  0x2d   :  { %257 = vmatprep.subr.bf16.mxu1 %v371_v0 }
  0x2e   :  { %p348_p5 = pnand %p347_p4, %p341_p1 }
  0x30   :  { %258 = vmatpush3.bf16.msra.mxu1 %v276_v6 }
  0x31   :  { %259 = vmatprep.subr.bf16.mxu1 %v371_v0 }
  0x34   :  { %260 = vmatpush3.bf16.msra.mxu1 %v277_v7 }
  0xeb   :  { %v120_v9 = vpop.f32.mrf.mxu0 }
  0xec   :  { %v121_v10 = vadd.f32 %v231_v8, %v120_v9 }
  0xed   :  { %v251_v11 = vpop.f32.mrf.mxu0 }
  0xee   :  { %278 = vtanh.f32 %v121_v10 }
  0xef   :  { %v123_v12 = vpop.f32.mrf.mxu0 }
  0xf1   :  { %v252_v13 = vpop.f32.mrf.mxu0 }
  0xfb   :  { %v279_v14 = vpop.eup %278 }
  0xfc   :  { %128 = vst.msk [vmem:[#allocation2] sm:$0x3] %vm127_vm2, %v279_v14 }
 0x103   :  { %v129_v15 = vld [vmem:[#allocation2] sm:$0x3] }
 0x104   :  { %v130_v16 = vpack.c.bf16 %v129_v15, %v129_v15 }
 0x106   :  { %262 = vmatmul.mubr.msk.bf16.vlgmr.msra.gmra.mxu1 %vm170_vm3, %v130_v16 }
 0x1c6   :  { %v208_v18 = vpop.f32.mrf.mxu1 }
 0x1c7   :  { %v209_v19 = vadd.f32 %v234_v17, %v208_v18 }
 0x1c8   :  { %v263_v20 = vpop.f32.mrf.mxu1 }
 0x1c9   :  { %214 = vst [vmem:[#allocation9] sm:$0x3] %v209_v19 }
 0x1ca   :  { %v211_v21 = vpop.f32.mrf.mxu1 }
 0x1cb   :  { %351 = shalt.err (!%p348_p5)
}
 0x1cc   :  { %224 = dma.vmem_to_hbm [thread:$0]  %s222_s12, 32, %s427_s5, [#allocation5]   ;;  %v264_v22 = vpop.f32.mrf.mxu1 }
 0x1cd   :  { %364 = dma.done.wait [#allocation5], 32  }
 0x1ce   :  { %365 = vsyncadd [#allocation5], 4294967264 }
 0x1cf   :  { %228 = vsyncpa [#allocation4], 1 }
 0x1d0   :  { %229 = vsyncpa [#allocation7], 1 }
 0x1d1   :  { %230 = vsyncpa [#allocation5], 1 }

</bundles_post_ra>
